<compile_context>
chip_gen: v6e
topology: v6e:2x2x1
jax: 0.10.0
libtpu: 0.0.40
codegen_flags: <defaults>
</compile_context>

<pallas_src>
import math
from functools import partial

import jax
import jax.numpy as jnp
import numpy as np
from jax import lax
from jax.experimental import pallas as pl
from jax.experimental.pallas import tpu as pltpu


# ---------------------------------------------------------------------------
# VMEM-aware sizing helpers
# ---------------------------------------------------------------------------
def _vmem_capacity_bytes(default=64 * 1024 * 1024):
    """Physical VMEM per core; conservative 64 MiB fallback (v7x-safe)."""
    try:
        info = pltpu.get_tpu_info()
        cap = getattr(info, "vmem_capacity_bytes", None)
        if cap:
            return int(cap)
    except Exception:
        pass
    return default


def _pick_rows(total_rows, per_row_bytes, fixed_bytes, vmem_cap, cap_rows):
    """Largest row-tile (multiple of 8) whose working set fits a VMEM budget."""
    budget = int(vmem_cap * 0.6) - fixed_bytes          # headroom for compiler scratch
    rows = budget // max(per_row_bytes, 1)
    rows = min(int(rows), cap_rows, total_rows)
    if rows >= total_rows:
        return total_rows                               # full extent: always legal
    return max(8, (rows // 8) * 8)


# ---------------------------------------------------------------------------
# Head-major linear projection:  out[b, hh, s, :] = x[b, s, :] @ W_h[hh] + b_h[hh]
# Writes the head-split layout directly (no XLA reshape/transpose afterwards).
# ---------------------------------------------------------------------------
def _proj_heads_kernel(x_ref, w_ref, b_ref, o_ref, *, h):
    # x_ref: (ts, d_model)  w_ref: (h, d_model, d_k)  b_ref: (h, 1, d_k)
    # o_ref: (h, ts, d_k)
    x = x_ref[...]                                     # one load, reused for all heads
    for hh in range(h):                                # static unroll: h MXU matmuls
        acc = jnp.dot(x, w_ref[hh], preferred_element_type=jnp.float32)
        o_ref[hh] = (acc + b_ref[hh]).astype(o_ref.dtype)


def project_heads(x, w_heads, b_heads, *, vmem_cap):
    """x: (B, S, d_model); w_heads: (h, d_model, d_k); b_heads: (h, 1, d_k)
    -> (B, h, S, d_k), head-major, written by the kernel's out_spec."""
    B, S, d_model = x.shape
    h, _, d_k = w_heads.shape
    in_b = jnp.dtype(x.dtype).itemsize
    w_b = jnp.dtype(w_heads.dtype).itemsize

    # Per-step VMEM: double-buffered W panels + bias (fixed) and per-row x/out/f32 acc.
    fixed = 2 * h * d_model * d_k * w_b + 2 * h * d_k * w_b
    per_row = 3 * d_model * in_b + 2 * h * d_k * in_b + 2 * d_k * 4
    ts = _pick_rows(S, per_row, fixed, vmem_cap, 512)
    # TODO(synk): for very large d_model on v7x the resident (h, d_model, d_k)
    # weight should be N-tiled; not needed at moderate d_model.

    grid = (B, pl.cdiv(S, ts))
    return pl.pallas_call(
        partial(_proj_heads_kernel, h=h),
        out_shape=jax.ShapeDtypeStruct((B, h, S, d_k), x.dtype),
        grid_spec=pltpu.PrefetchScalarGridSpec(
            num_scalar_prefetch=0,
            grid=grid,
            in_specs=[
                pl.BlockSpec((None, ts, d_model), lambda b, si: (b, si, 0)),
                pl.BlockSpec((h, d_model, d_k), lambda b, si: (0, 0, 0)),   # constant index
                pl.BlockSpec((h, 1, d_k), lambda b, si: (0, 0, 0)),         # constant index
            ],
            out_specs=pl.BlockSpec((None, h, ts, d_k), lambda b, si: (b, 0, si, 0)),
        ),
        compiler_params=pltpu.CompilerParams(
            dimension_semantics=("parallel", "parallel"),
            vmem_limit_bytes=int(vmem_cap * 0.75),
        ),
    )(x, w_heads, b_heads)


# ---------------------------------------------------------------------------
# Attention-probability kernel: grid (B, h, q_tiles); K slab resident per (b,h),
# aspect bias computed once per (b,h) and reused across q tiles.
# ---------------------------------------------------------------------------
def _phattn_kernel(q_ref, k_ref, a_ref, o_ref, bias_ref):
    # q_ref: (tq, d_k)  k_ref: (Sk, d_k)  a_ref: (1, d_k)
    # o_ref: (tq, Sk)   bias_ref: (1, Sk) f32 scratch (persists across qi steps)
    qi = pl.program_id(2)

    @pl.when(qi == 0)
    def _():
        # tanh(aspect @ K^T): one (1, Sk) row per (batch, head).
        ab = lax.dot_general(a_ref[...], k_ref[...], (((1,), (1,)), ((), ())),
                             preferred_element_type=jnp.float32)
        bias_ref[...] = jnp.tanh(ab)

    # q @ K^T (1/sqrt(d_k) already folded into the q projection weights);
    # operands stay in input dtype (native bf16 MXU path), f32 accumulation.
    scores = lax.dot_general(q_ref[...], k_ref[...], (((1,), (1,)), ((), ())),
                             preferred_element_type=jnp.float32)        # (tq, Sk)
    scores = scores + bias_ref[...]                                     # broadcast (1, Sk)

    # Numerically stable softmax over keys (f32). Note: padded rows of a partial
    # last q tile go through exp on undefined data but are never written back.
    m = jnp.max(scores, axis=-1, keepdims=True)
    p = jnp.exp(scores - m)
    denom = jnp.sum(p, axis=-1, keepdims=True)
    o_ref[...] = (p * pl.reciprocal(denom, approx=False)).astype(o_ref.dtype)


def ph_multi_head_attention(query, key, aspect, params, *, h,
                            out_dtype=jnp.float32):
    """query: (B, Sq, d_model); key: (B, Sk, d_model); aspect: (B, d_model).

    params (PyTorch layout): wq, wk: (d_model, d_model); bq, bk: (d_model,);
                             wd: (d_k, d_model); bd: (d_k,)
    Returns attention probabilities (B, h, Sq, Sk) in `out_dtype`.
    Recommended production setting: out_dtype=jnp.bfloat16 (halves the dominant
    HBM writeback of the probabilities).
    """
    B, Sq, d_model = query.shape
    _, Sk, _ = key.shape
    d_k = d_model // h
    scale = 1.0 / math.sqrt(d_k)
    dtype = query.dtype
    vmem_cap = _vmem_capacity_bytes()

    # Per-head weight panels (h, d_model, d_k), pre-transposed once host-side;
    # 1/sqrt(d_k) folded into the q projection (free, removes one VPU pass/tile).
    wq_heads = (params["wq"] * scale).T.reshape(d_model, h, d_k).transpose(1, 0, 2).astype(dtype)
    bq_heads = (params["bq"] * scale).reshape(h, 1, d_k).astype(dtype)
    wk_heads = params["wk"].T.reshape(d_model, h, d_k).transpose(1, 0, 2).astype(dtype)
    bk_heads = params["bk"].reshape(h, 1, d_k).astype(dtype)

    # Head-major projections written directly by the kernel (no XLA head transpose).
    q_heads = project_heads(query, wq_heads, bq_heads, vmem_cap=vmem_cap)   # (B, h, Sq, d_k)
    k_heads = project_heads(key, wk_heads, bk_heads, vmem_cap=vmem_cap)     # (B, h, Sk, d_k)

    # Aspect dense (B, d_model) @ (d_model, d_k): tiny and identical across heads
    # (the reference expands over h BEFORE the shared dense) -> plain jnp, keyed by b.
    aspect_proj = (aspect @ params["wd"].T + params["bd"]).astype(dtype).reshape(B, 1, d_k)

    in_b = jnp.dtype(dtype).itemsize
    out_b = jnp.dtype(out_dtype).itemsize
    # Full per-step VMEM footprint: double-buffered K slab + aspect row + bias
    # scratch (fixed) plus double-buffered q tile, double-buffered output tile and
    # ~2 live f32 score copies per q row (variable).
    fixed = 2 * Sk * d_k * in_b + 2 * d_k * in_b + 8 * Sk * 4
    per_row = 2 * d_k * in_b + 2 * Sk * out_b + 2 * Sk * 4
    tq = _pick_rows(Sq, per_row, fixed, vmem_cap, 1024)
    # TODO(synk): if Sk grows so long that the resident (Sk, d_k) K slab alone
    # overflows VMEM, a key-tiled (flash-style) variant is needed; not implemented
    # since the module returns the full (tq, Sk) probability rows anyway.

    grid = (B, h, pl.cdiv(Sq, tq))
    attn = pl.pallas_call(
        _phattn_kernel,
        out_shape=jax.ShapeDtypeStruct((B, h, Sq, Sk), out_dtype),
        grid_spec=pltpu.PrefetchScalarGridSpec(
            num_scalar_prefetch=0,
            grid=grid,
            in_specs=[
                pl.BlockSpec((None, None, tq, d_k), lambda b, hh, qi: (b, hh, qi, 0)),
                pl.BlockSpec((None, None, Sk, d_k), lambda b, hh, qi: (b, hh, 0, 0)),
                pl.BlockSpec((None, 1, d_k), lambda b, hh, qi: (b, 0, 0)),
            ],
            out_specs=pl.BlockSpec((None, None, tq, Sk),
                                   lambda b, hh, qi: (b, hh, qi, 0)),
            scratch_shapes=[pltpu.VMEM((1, Sk), jnp.float32)],
        ),
        compiler_params=pltpu.CompilerParams(
            # (b, h) parallel: megacore shards by head, preserving per-core
            # one-K-DMA-per-head reuse.  qi must be "arbitrary" (sequential) so the
            # qi==0 bias-scratch hoist is well-defined.
            dimension_semantics=("parallel", "parallel", "arbitrary"),
            vmem_limit_bytes=int(vmem_cap * 0.75),
        ),
    )(q_heads, k_heads, aspect_proj)

    return attn


# ---------------------------------------------------------------------------
# Pure-jnp reference (mirrors the PyTorch forward) for a correctness check.
# ---------------------------------------------------------------------------
def _reference(query, key, aspect, params, *, h):
    B, Sq, d_model = query.shape
    _, Sk, _ = key.shape
    d_k = d_model // h
    q = query @ params["wq"].T + params["bq"]
    k = key @ params["wk"].T + params["bk"]
    q = q.reshape(B, Sq, h, d_k).transpose(0, 2, 1, 3)
    k = k.reshape(B, Sk, h, d_k).transpose(0, 2, 1, 3)
    a = aspect @ params["wd"].T + params["bd"]                      # (B, d_k)
    scores = jnp.einsum("bhqd,bhkd->bhqk", q, k) / math.sqrt(d_k)
    a_scores = jnp.tanh(jnp.einsum("bd,bhkd->bhk", a, k))[:, :, None, :]
    return jax.nn.softmax(scores + a_scores, axis=-1)


if __name__ == "__main__":
    B, h, d_model = 2, 4, 32
    Sq = Sk = 8
    d_k = d_model // h

    root = jax.random.PRNGKey(0)
    ks = jax.random.split(root, 9)
    query = jax.random.normal(ks[0], (B, Sq, d_model), jnp.float32)
    key_in = jax.random.normal(ks[1], (B, Sk, d_model), jnp.float32)
    aspect = jax.random.normal(ks[2], (B, d_model), jnp.float32)
    params = {
        "wq": jax.random.normal(ks[3], (d_model, d_model), jnp.float32) / math.sqrt(d_model),
        "bq": 0.01 * jax.random.normal(ks[4], (d_model,), jnp.float32),
        "wk": jax.random.normal(ks[5], (d_model, d_model), jnp.float32) / math.sqrt(d_model),
        "bk": 0.01 * jax.random.normal(ks[6], (d_model,), jnp.float32),
        "wd": jax.random.normal(ks[7], (d_k, d_model), jnp.float32) / math.sqrt(d_model),
        "bd": 0.01 * jax.random.normal(ks[8], (d_k,), jnp.float32),
    }

    attn = ph_multi_head_attention(query, key_in, aspect, params, h=h)
    attn = jax.block_until_ready(attn)

    ref = _reference(query, key_in, aspect, params, h=h)
    np.testing.assert_allclose(np.asarray(attn), np.asarray(ref), rtol=2e-2, atol=2e-2)
    assert attn.shape == (B, h, Sq, Sk)
    print("KERNEL_OK")
</pallas_src>

<mosaic_0001>
module attributes {stable_mosaic.version = 11 : i64} {
  func.func @_proj_heads_kernel(%arg0: i32, %arg1: i32, %arg2: memref<1x8x32xf32, #tpu.memory_space<vmem>>, %arg3: memref<4x32x8xf32, #tpu.memory_space<vmem>>, %arg4: memref<4x1x8xf32, #tpu.memory_space<vmem>>, %arg5: memref<1x4x8x8xf32, #tpu.memory_space<vmem>>) attributes {dimension_semantics = [#tpu.dimension_semantics<parallel>, #tpu.dimension_semantics<parallel>], iteration_bounds = array<i64: 2, 1>, scalar_prefetch = 0 : i64, scratch_operands = 0 : i64, tpu.core_type = #tpu.core_type<tc>, window_params = [{transform_indices = @transform_0, window_bounds = array<i64: 1, 8, 32>}, {pipeline_mode = #tpu.pipeline_mode<synchronous>, transform_indices = @transform_1, window_bounds = array<i64: 4, 32, 8>}, {pipeline_mode = #tpu.pipeline_mode<synchronous>, transform_indices = @transform_2, window_bounds = array<i64: 4, 1, 8>}, {transform_indices = @transform_3, window_bounds = array<i64: 1, 4, 8, 8>}]} {
    %c0 = arith.constant 0 : index
    %c0_0 = arith.constant 0 : index
    %c0_1 = arith.constant 0 : index
    %0 = vector.load %arg2[%c0, %c0_0, %c0_1] : memref<1x8x32xf32, #tpu.memory_space<vmem>>, vector<1x8x32xf32>
    %1 = vector.shape_cast %0 : vector<1x8x32xf32> to vector<8x32xf32>
    %c0_2 = arith.constant 0 : index
    %c0_3 = arith.constant 0 : index
    %c0_4 = arith.constant 0 : index
    %2 = vector.load %arg3[%c0_2, %c0_3, %c0_4] : memref<4x32x8xf32, #tpu.memory_space<vmem>>, vector<1x32x8xf32>
    %3 = vector.shape_cast %2 : vector<1x32x8xf32> to vector<32x8xf32>
    %cst = arith.constant dense<0.000000e+00> : vector<8x8xf32>
    %4 = tpu.matmul %1, %3, %cst {dimension_numbers = #tpu.dot_dimension_numbers<[1], [0], [0], [1], [0, 0, 1, 1], [], []>} : vector<8x32xf32>, vector<32x8xf32>, vector<8x8xf32> -> vector<8x8xf32>
    %c0_5 = arith.constant 0 : index
    %c0_6 = arith.constant 0 : index
    %c0_7 = arith.constant 0 : index
    %5 = vector.load %arg4[%c0_5, %c0_6, %c0_7] : memref<4x1x8xf32, #tpu.memory_space<vmem>>, vector<1x1x8xf32>
    %6 = vector.shape_cast %5 : vector<1x1x8xf32> to vector<1x8xf32>
    %7 = vector.broadcast %6 : vector<1x8xf32> to vector<8x8xf32>
    %8 = arith.addf %4, %7 : vector<8x8xf32>
    %c0_8 = arith.constant 0 : index
    %c0_9 = arith.constant 0 : index
    %c0_10 = arith.constant 0 : index
    %c0_11 = arith.constant 0 : index
    %9 = vector.load %arg5[%c0_8, %c0_9, %c0_10, %c0_11] : memref<1x4x8x8xf32, #tpu.memory_space<vmem>>, vector<1x1x8x8xf32>
    %10 = vector.shape_cast %9 : vector<1x1x8x8xf32> to vector<8x8xf32>
    %11 = vector.shape_cast %8 : vector<8x8xf32> to vector<1x1x8x8xf32>
    tpu.vector_store %arg5[%c0_8, %c0_9, %c0_10, %c0_11], %11 {strides = array<i32>} : memref<1x4x8x8xf32, #tpu.memory_space<vmem>>, vector<1x1x8x8xf32>,
    %c1 = arith.constant 1 : index
    %c0_12 = arith.constant 0 : index
    %c0_13 = arith.constant 0 : index
    %12 = vector.load %arg3[%c1, %c0_12, %c0_13] : memref<4x32x8xf32, #tpu.memory_space<vmem>>, vector<1x32x8xf32>
    %13 = vector.shape_cast %12 : vector<1x32x8xf32> to vector<32x8xf32>
    %cst_14 = arith.constant dense<0.000000e+00> : vector<8x8xf32>
    %14 = tpu.matmul %1, %13, %cst_14 {dimension_numbers = #tpu.dot_dimension_numbers<[1], [0], [0], [1], [0, 0, 1, 1], [], []>} : vector<8x32xf32>, vector<32x8xf32>, vector<8x8xf32> -> vector<8x8xf32>
    %c1_15 = arith.constant 1 : index
    %c0_16 = arith.constant 0 : index
    %c0_17 = arith.constant 0 : index
    %15 = vector.load %arg4[%c1_15, %c0_16, %c0_17] : memref<4x1x8xf32, #tpu.memory_space<vmem>>, vector<1x1x8xf32>
    %16 = vector.shape_cast %15 : vector<1x1x8xf32> to vector<1x8xf32>
    %17 = vector.broadcast %16 : vector<1x8xf32> to vector<8x8xf32>
    %18 = arith.addf %14, %17 : vector<8x8xf32>
    %c0_18 = arith.constant 0 : index
    %c1_19 = arith.constant 1 : index
    %c0_20 = arith.constant 0 : index
    %c0_21 = arith.constant 0 : index
    %19 = vector.load %arg5[%c0_18, %c1_19, %c0_20, %c0_21] : memref<1x4x8x8xf32, #tpu.memory_space<vmem>>, vector<1x1x8x8xf32>
    %20 = vector.shape_cast %19 : vector<1x1x8x8xf32> to vector<8x8xf32>
    %21 = vector.shape_cast %18 : vector<8x8xf32> to vector<1x1x8x8xf32>
    tpu.vector_store %arg5[%c0_18, %c1_19, %c0_20, %c0_21], %21 {strides = array<i32>} : memref<1x4x8x8xf32, #tpu.memory_space<vmem>>, vector<1x1x8x8xf32>,
    %c2 = arith.constant 2 : index
    %c0_22 = arith.constant 0 : index
    %c0_23 = arith.constant 0 : index
    %22 = vector.load %arg3[%c2, %c0_22, %c0_23] : memref<4x32x8xf32, #tpu.memory_space<vmem>>, vector<1x32x8xf32>
    %23 = vector.shape_cast %22 : vector<1x32x8xf32> to vector<32x8xf32>
    %cst_24 = arith.constant dense<0.000000e+00> : vector<8x8xf32>
    %24 = tpu.matmul %1, %23, %cst_24 {dimension_numbers = #tpu.dot_dimension_numbers<[1], [0], [0], [1], [0, 0, 1, 1], [], []>} : vector<8x32xf32>, vector<32x8xf32>, vector<8x8xf32> -> vector<8x8xf32>
    %c2_25 = arith.constant 2 : index
    %c0_26 = arith.constant 0 : index
    %c0_27 = arith.constant 0 : index
    %25 = vector.load %arg4[%c2_25, %c0_26, %c0_27] : memref<4x1x8xf32, #tpu.memory_space<vmem>>, vector<1x1x8xf32>
    %26 = vector.shape_cast %25 : vector<1x1x8xf32> to vector<1x8xf32>
    %27 = vector.broadcast %26 : vector<1x8xf32> to vector<8x8xf32>
    %28 = arith.addf %24, %27 : vector<8x8xf32>
    %c0_28 = arith.constant 0 : index
    %c2_29 = arith.constant 2 : index
    %c0_30 = arith.constant 0 : index
    %c0_31 = arith.constant 0 : index
    %29 = vector.load %arg5[%c0_28, %c2_29, %c0_30, %c0_31] : memref<1x4x8x8xf32, #tpu.memory_space<vmem>>, vector<1x1x8x8xf32>
    %30 = vector.shape_cast %29 : vector<1x1x8x8xf32> to vector<8x8xf32>
    %31 = vector.shape_cast %28 : vector<8x8xf32> to vector<1x1x8x8xf32>
    tpu.vector_store %arg5[%c0_28, %c2_29, %c0_30, %c0_31], %31 {strides = array<i32>} : memref<1x4x8x8xf32, #tpu.memory_space<vmem>>, vector<1x1x8x8xf32>,
    %c3 = arith.constant 3 : index
    %c0_32 = arith.constant 0 : index
    %c0_33 = arith.constant 0 : index
    %32 = vector.load %arg3[%c3, %c0_32, %c0_33] : memref<4x32x8xf32, #tpu.memory_space<vmem>>, vector<1x32x8xf32>
    %33 = vector.shape_cast %32 : vector<1x32x8xf32> to vector<32x8xf32>
    %cst_34 = arith.constant dense<0.000000e+00> : vector<8x8xf32>
    %34 = tpu.matmul %1, %33, %cst_34 {dimension_numbers = #tpu.dot_dimension_numbers<[1], [0], [0], [1], [0, 0, 1, 1], [], []>} : vector<8x32xf32>, vector<32x8xf32>, vector<8x8xf32> -> vector<8x8xf32>
    %c3_35 = arith.constant 3 : index
    %c0_36 = arith.constant 0 : index
    %c0_37 = arith.constant 0 : index
    %35 = vector.load %arg4[%c3_35, %c0_36, %c0_37] : memref<4x1x8xf32, #tpu.memory_space<vmem>>, vector<1x1x8xf32>
    %36 = vector.shape_cast %35 : vector<1x1x8xf32> to vector<1x8xf32>
    %37 = vector.broadcast %36 : vector<1x8xf32> to vector<8x8xf32>
    %38 = arith.addf %34, %37 : vector<8x8xf32>
    %c0_38 = arith.constant 0 : index
    %c3_39 = arith.constant 3 : index
    %c0_40 = arith.constant 0 : index
    %c0_41 = arith.constant 0 : index
    %39 = vector.load %arg5[%c0_38, %c3_39, %c0_40, %c0_41] : memref<1x4x8x8xf32, #tpu.memory_space<vmem>>, vector<1x1x8x8xf32>
    %40 = vector.shape_cast %39 : vector<1x1x8x8xf32> to vector<8x8xf32>
    %41 = vector.shape_cast %38 : vector<8x8xf32> to vector<1x1x8x8xf32>
    tpu.vector_store %arg5[%c0_38, %c3_39, %c0_40, %c0_41], %41 {strides = array<i32>} : memref<1x4x8x8xf32, #tpu.memory_space<vmem>>, vector<1x1x8x8xf32>,
    return
  }
  func.func @transform_0(%arg0: i32, %arg1: i32) -> (i32, i32, i32) {
    %c0_i32 = arith.constant 0 : i32
    %c0_i32_0 = arith.constant 0 : i32
    return %arg0, %arg1, %c0_i32 : i32, i32, i32
  }
  func.func @transform_1(%arg0: i32, %arg1: i32) -> (i32, i32, i32) {
    %c0_i32 = arith.constant 0 : i32
    %c0_i32_0 = arith.constant 0 : i32
    %c0_i32_1 = arith.constant 0 : i32
    %c0_i32_2 = arith.constant 0 : i32
    return %c0_i32, %c0_i32_0, %c0_i32_1 : i32, i32, i32
  }
  func.func @transform_2(%arg0: i32, %arg1: i32) -> (i32, i32, i32) {
    %c0_i32 = arith.constant 0 : i32
    %c0_i32_0 = arith.constant 0 : i32
    %c0_i32_1 = arith.constant 0 : i32
    %c0_i32_2 = arith.constant 0 : i32
    return %c0_i32, %c0_i32_0, %c0_i32_1 : i32, i32, i32
  }
  func.func @transform_3(%arg0: i32, %arg1: i32) -> (i32, i32, i32, i32) {
    %c0_i32 = arith.constant 0 : i32
    %c0_i32_0 = arith.constant 0 : i32
    %c0_i32_1 = arith.constant 0 : i32
    return %arg0, %c0_i32, %arg1, %c0_i32_0 : i32, i32, i32, i32
  }
}

</mosaic_0001>

<bundles_post_ra>
// kernel: tpu_custom_call.1
= control target key start
LH: loop header
LB: loop body
LE: loop exit
PB: predicated region body
PF: predicated region fallthrough
CT: control target
= control target key end

     0   :  { %8 = vsyncpa [#allocation3], 0  ;;  %s1075_s0 = inlined_call_operand.vmem [shape: f32[2,8,32], index: 0, kind: input, shape index: {}]   ;;  %s1076_s1 = inlined_call_operand.vmem [shape: f32[4,32,8], index: 1, kind: input, shape index: {}]   ;;  %s1077_s2 = inlined_call_operand.vmem [shape: f32[4,1,8], index: 2, kind: input, shape index: {}]   ;;  %s1078_s3 = inlined_call_operand.hbm [shape: f32[2,4,8,8], index: 3, kind: output, shape index: {}]  }
   0x1   :  { %10 = vsyncpa [#allocation3 + $0x1], 0  ;;  %s889_s12 = smov 0   ;;  %s891_s13 = smov 0  }
   0x2   :  { %s893_s14 = smov 0   ;;  %s895_s15 = smov 0  }
   0x3   :  { %s897_s16 = smov 0   ;;  %s899_s17 = smov 0  }
   0x4 LB: > { %s624_s18 = sadd.s32 4294967295, %s862_s17   ;;  %s625_s19 = sadd.s32 4294967294, %s862_s17   ;;  %s862_s17 = sphi %s899_s17, %s16_s17   ;;  %s858_s16 = sphi %s897_s16, %s1085_s16   ;;  %s854_s15 = sphi %s895_s15, %s1084_s15   ;;  %s850_s14 = sphi %s893_s14, %s1083_s14   ;;  %s846_s13 = sphi %s891_s13, %s1082_s13   ;;  %s842_s12 = sphi %s889_s12, %s1081_s12  }
   0x5   : > { %s28_s20 = sadd.s32 1, %s858_s16  ;;  %s107_s21 = sadd.s32 1, %s850_s14 }
   0x6   : > { %p30_p0 = scmp.ge.s32.totalorder %s28_s20, 2  ;;  %p117_p1 = scmp.ne.s32.totalorder %s850_s14, %s846_s13 }
   0x7   : > { %p118_p2 = scmp.eq.s32.totalorder %s624_s18, 1  ;;  %p123_p3 = scmp.ne.s32.totalorder %s846_s13, %s842_s12 }
   0x8   : > { %s1087_s20 = smov (%p30_p0, %s28_s20), 0  ;;  %p124_p5 = scmp.eq.s32.totalorder %s625_s19, 1 }
   0x9   : > { %p929_p4 = por %p118_p2, %p117_p1  ;;  %s102_s23 = ssub.s32 %s858_s16, %s1087_s20 }
   0xa   : > { %p628_p6 = scmp.ge.s32.totalorder %s862_s17, 1  ;;  %p105_p7 = scmp.eq.s32.totalorder %s102_s23, 0 }
   0xb   : > { %p936_p8 = por %p124_p5, %p123_p3  ;;  %p158_p9 = scmp.lt.s32.totalorder %s862_s17, 3 }
   0xc   : > { %s942_s25 = scalar_select %p105_p7, %s850_s14, %s107_s21  }
   0xd   : > { %p159_p10 = pnand %p628_p6, %p158_p9 }
   0xe   : > { %p184_p11 = scmp.lt.s32.totalorder (!%p159_p10), %s854_s15, 1  ;;  %s181_s29 = sand.u32 (!%p159_p10), 1, %s846_s13  }
   0xf   : > { %162 = sbr.rel (%p159_p10) target bundleno = 249 (0xf9), region = 32  ;;  %s629_s30 = sshll.u32 (!%p159_p10), %s181_s29, 5 }
  0x10   : > { %s183_s8 = scalar_lea.vmem (!%p159_p10), [#allocation2], %s629_s30  ;;  %s662_s10 = sshll.u32 (!%p159_p10), %s854_s15, 9 }
  0x11   : > { %s549_s9 = sshll.u32 (!%p159_p10), %s183_s8, 4  ;;  %s866_s30 = smov (!%p159_p10), [#allocation2]   ;;  %s1021_s9 = int_to_ptr.vmem [resolvable:$true] %s549_s9 }
  0x12   : > { %s786_s28 = scalar_lea.vmem (!%p159_p10), %s1021_s9, 512  ;;  %s790_s4 = sshll.u32 (!%p159_p10), %s866_s30, 4  ;;  %s791_s4 = int_to_ptr.vmem [resolvable:$false] %s790_s4 }
  0x13   : > { %p787_p12 = scmp.ne.s32.totalorder (!%p159_p10), %s1021_s9, %s786_s28  ;;  %s792_s5 = scalar_lea.vmem (!%p159_p10), %s791_s4, 1024 }
  0x14   : > { %v195_v0 = vld [vmem:[%s1076_s1 + $0x18] sm:$0xff]  ;;  %v864_v2 = vmov 0.0   ;;  %v194_v3 = vld [vmem:[%s1076_s1 + $0x10] sm:$0xff]  ;;  %s185_s7 = scalar_select %p184_p11, %s854_s15, 1  ;;  %v193_v5 = vld [vmem:[%s1076_s1 + $0x8] sm:$0xff]  ;;  %vm203_vm0 = vcmask 261120  }
  0x15   : > { %v636_v1 = vld [vmem:[%s1076_s1 + $0x38] sm:$0xff]  ;;  %683 = vmatprep.subr.mxu0 %v864_v2  ;;  %694 = vmatprep.subr.mxu1 %v864_v2  ;;  %v635_v4 = vld [vmem:[%s1076_s1 + $0x30] sm:$0xff]  ;;  %v634_v6 = vld [vmem:[%s1076_s1 + $0x28] sm:$0xff]  ;;  %vm865_vm1 = vmmov 0   ;;  %vm277_vm2 = vcmask 64512   ;;  %s1030_s15 = scalar_lea.sflag [#allocation3], %s181_s29  ;;  %p788_p13 = pnand %p787_p12, %p929_p4 }
  0x16   : > { %684 = vmatpush3.msra.mxu0 %v195_v0  ;;  %695 = vmatpush3.msra.mxu1 %v636_v1  ;;  %s630_s18 = sshll.u32 %s185_s7, 3  ;;  %v192_v7 = vld [vmem:[%s1076_s1] sm:$0xff]  ;;  %v644_v10 = vld [vmem:[%s1076_s1 + $0x58] sm:$0xff]  ;;  %v643_v12 = vld [vmem:[%s1076_s1 + $0x50] sm:$0xff]  ;;  %p793_p1 = scmp.lt.s32.totalorder %s1021_s9, %s791_s4 }
  0x17   : > { %685 = vmatprep.subr.mxu0 %v864_v2  ;;  %696 = vmatprep.subr.mxu1 %v864_v2  ;;  %s190_s27 = scalar_lea.vmem %s1075_s0, %s630_s18  ;;  %v633_v8 = vld [vmem:[%s1076_s1 + $0x20] sm:$0xff]  ;;  %v652_v11 = vld [vmem:[%s1076_s1 + $0x78] sm:$0xff]  ;;  %v651_v13 = vld [vmem:[%s1076_s1 + $0x70] sm:$0xff]  ;;  %p789_p0 = pneg %p788_p13 }
  0x18   : > { %686 = vmatpush3.msra.mxu0 %v194_v3  ;;  %697 = vmatpush3.msra.mxu1 %v635_v4  ;;  %v191_v9 = vld [vmem:[%s190_s27] sm:$0xff]  ;;  %v642_v14 = vld [vmem:[%s1076_s1 + $0x48] sm:$0xff]  ;;  %s1026_s27 = scalar_lea.hbm %s1078_s3, %s662_s10  ;;  %p794_p2 = scmp.lt.s32.totalorder %s792_s5, %s786_s28 }
  0x19   : > { %687 = vmatprep.subr.mxu0 %v864_v2  ;;  %698 = vmatprep.subr.mxu1 %v864_v2  ;;  %v650_v15 = vld [vmem:[%s1076_s1 + $0x68] sm:$0xff]  ;;  %v641_v16 = vld [vmem:[%s1076_s1 + $0x40] sm:$0xff] }
  0x1a   : > { %688 = vmatpush3.msra.mxu0 %v193_v5  ;;  %699 = vmatpush3.msra.mxu1 %v634_v6  ;;  %v649_v17 = vld [vmem:[%s1076_s1 + $0x60] sm:$0xff]  ;;  %p795_p3 = por %p794_p2, %p793_p1 }
  0x1b   : > { %689 = vmatprep.subr.mxu0 %v864_v2  ;;  %700 = vmatprep.subr.mxu1 %v864_v2  ;;  %v631_v18 = vld [vmem:[%s1077_s2] ss:$0 sm:$0xff]  ;;  %v638_v19 = vld [vmem:[%s1077_s2 + $0x1] ss:$0 sm:$0xff]  ;;  %v646_v26 = vld [vmem:[%s1077_s2 + $0x2] ss:$0 sm:$0xff] }
  0x1c   : > { %690 = vmatpush3.msra.mxu0 %v192_v7  ;;  %691 = vmatprep.mubr.msk.f32.mxu0 %vm865_vm1, %v864_v2  ;;  %v654_v27 = vld [vmem:[%s1077_s2 + $0x3] ss:$0 sm:$0xff]  ;;  %p796_p5 = pnand %p795_p3, %p789_p0 }
  0x1d   : > { %701 = vmatpush3.msra.mxu1 %v633_v8  ;;  %702 = vmatprep.mubr.msk.f32.mxu1 %vm865_vm1, %v864_v2 }
  0x1e   : > { %692 = vmatmul.mubr.msk.f32.vlgmr.msra.gmra.mxu0 %vm203_vm0, %v191_v9  ;;  %703 = vmatmul.mubr.msk.f32.vlgmr.msra.gmra.mxu1 %vm203_vm0, %v191_v9 }
  0x1f   : > { %705 = vmatprep.subr.mxu0 %v864_v2  ;;  %716 = vmatprep.subr.mxu1 %v864_v2 }
  0x20   : > { %706 = vmatpush3.msra.mxu0 %v644_v10  ;;  %717 = vmatpush3.msra.mxu1 %v652_v11 }
  0x21   : > { %707 = vmatprep.subr.mxu0 %v864_v2  ;;  %718 = vmatprep.subr.mxu1 %v864_v2 }
  0x22   : > { %708 = vmatpush3.msra.mxu0 %v643_v12  ;;  %719 = vmatpush3.msra.mxu1 %v651_v13 }
  0x23   : > { %709 = vmatprep.subr.mxu0 %v864_v2  ;;  %720 = vmatprep.subr.mxu1 %v864_v2 }
  0x24   : > { %710 = vmatpush3.msra.mxu0 %v642_v14  ;;  %721 = vmatpush3.msra.mxu1 %v650_v15 }
  0x25   : > { %711 = vmatprep.subr.mxu0 %v864_v2  ;;  %722 = vmatprep.subr.mxu1 %v864_v2 }
  0x26   : > { %712 = vmatpush3.msra.mxu0 %v641_v16  ;;  %713 = vmatprep.mubr.msk.f32.mxu0 %vm865_vm1, %v864_v2 }
  0x27   : > { %723 = vmatpush3.msra.mxu1 %v649_v17  ;;  %724 = vmatprep.mubr.msk.f32.mxu1 %vm865_vm1, %v864_v2 }
  0x28   : > { %714 = vmatmul.mubr.msk.f32.vlgmr.msra.gmra.mxu0 %vm203_vm0, %v191_v9  ;;  %725 = vmatmul.mubr.msk.f32.vlgmr.msra.gmra.mxu1 %vm203_vm0, %v191_v9 }
  0xde   : > { %v273_v20 = vpop.f32.mrf.mxu0  ;;  %v358_v21 = vpop.f32.mrf.mxu1 }
  0xdf   : > { %v274_v22 = vadd.f32 %v631_v18, %v273_v20  ;;  %v359_v23 = vadd.f32 %v638_v19, %v358_v21 }
  0xe0   : > { %v693_v24 = vpop.f32.mrf.mxu0  ;;  %v704_v25 = vpop.f32.mrf.mxu1 }
  0xe1   : > { %278 = vst.msk [vmem:[%s183_s8] sm:$0xff] %vm277_vm2, %v274_v22  ;;  %640 = vst.msk [vmem:[%s183_s8 + $0x8] sm:$0xff] %vm277_vm2, %v359_v23 }
  0xe8   : > { %v443_v28 = vpop.f32.mrf.mxu0  ;;  %v528_v29 = vpop.f32.mrf.mxu1 }
  0xe9   : > { %v444_v30 = vadd.f32 %v646_v26, %v443_v28  ;;  %v529_v31 = vadd.f32 %v654_v27, %v528_v29 }
  0xea   : > { %v715_v32 = vpop.f32.mrf.mxu0  ;;  %v726_v33 = vpop.f32.mrf.mxu1 }
  0xeb   : > { %648 = vst.msk [vmem:[%s183_s8 + $0x10] sm:$0xff] %vm277_vm2, %v444_v30  ;;  %656 = vst.msk [vmem:[%s183_s8 + $0x18] sm:$0xff] %vm277_vm2, %v529_v31 }
  0xec   : > { %799 = shalt.err (!%p796_p5)
}
  0xed   : > { %s800_s29 = scalar_lea.hbm %s1026_s27, 512  ;;  %s804_s8 = scalar_lea.hbm %s1078_s3, 1024 }
  0xee   : > { %p801_p6 = scmp.ne.s32.totalorder %s1026_s27, %s800_s29  ;;  %p805_p10 = scmp.lt.s32.totalorder %s1026_s27, %s1078_s3 }
  0xef   : > { %p806_p11 = scmp.lt.s32.totalorder %s804_s8, %s800_s29 }
  0xf0   : > { %p802_p7 = pnand %p801_p6, %p929_p4 }
  0xf1   : > { %p807_p12 = por %p806_p11, %p805_p10 }
  0xf2   : > { %p803_p9 = pneg %p802_p7 }
  0xf4   : > { %p808_p13 = pnand %p807_p12, %p803_p9 }
  0xf6   : > { %811 = shalt.err (!%p808_p13)
}
  0xf7   : > { %s867_s18 = smov 128   ;;  %s868_s19 = smov 8  }
  0xf8   : > { %727 = dma.vmem_to_hbm [thread:$0]  (%p929_p4), %s1021_s9, 512, %s1026_s27, %s1030_s15, %s867_s18, %s867_s18, %s868_s19  }
  0xf9 PF: > { %p733_p0 = scmp.ge.s32.totalorder %s862_s17, 2  ;;  %s564_s21 = sand.u32 1, %s842_s12  }
  0xfa   : > { %s565_s23 = scalar_lea.sflag [#allocation3], %s564_s21 }
  0xfb   : > { %p730_p1 = pnand %p733_p0, %p936_p8 }
  0xfd   : > { %p731_p2 = pneg %p730_p1 }
  0xff   : > { %837 = dma.done.wait (%p731_p2), %s565_s23, 512  }
 0x100   : > { %839 = vsyncadd (%p731_p2), %s565_s23, 4294966784  ;;  %s16_s17 = sadd.s32 1, %s862_s17   ;;  %s1081_s12 = smov %s846_s13 }
 0x101   : > { %p13_p3 = scmp.ge.s32.totalorder %s16_s17, 4   ;;  %s1082_s13 = smov %s850_s14 }
 0x102   : > { %s1083_s14 = smov %s942_s25  ;;  %s1084_s15 = smov %s858_s16 }
 0x103   : > { %s1085_s16 = smov %s1087_s20  ;;  %15 = sbr.rel (!%p13_p3) target bundleno = 4 (0x4), region = 76 }
 0x108   :  { %570 = vsyncpa [#allocation3], 1 }
 0x109   :  { %572 = vsyncpa [#allocation3 + $0x1], 1 }

</bundles_post_ra>
